<compile_context>
chip_gen: v5e
topology: v5e:2x2
jax: 0.10.0
libtpu: 0.0.40
codegen_flags: <defaults>
</compile_context>

<pallas_src>
import functools

import jax
import jax.numpy as jnp
from jax.experimental import pallas as pl
from jax.experimental.pallas import tpu as pltpu


def _layernorm_kernel(x_ref, a_ref, b_ref, o_ref, *, eps, feat):
    # x_ref: (tile_rows, feat), a_ref/b_ref: (1, feat)
    x = x_ref[...].astype(jnp.float32)

    inv_n = jnp.float32(1.0 / feat)
    # NOTE: feat == 1 would divide by zero here (torch.std also yields NaN).
    inv_nm1 = jnp.float32(1.0 / (feat - 1)) if feat > 1 else jnp.float32(0.0)

    # One-pass statistics: sum(x) and sum(x*x), derive mean / unbiased var.
    s1 = jnp.sum(x, axis=-1, keepdims=True)
    s2 = jnp.sum(x * x, axis=-1, keepdims=True)
    mean = s1 * inv_n
    # sum((x - mean)^2) == s2 - mean * s1
    var = (s2 - mean * s1) * inv_nm1
    var = jnp.maximum(var, 0.0)             # guard tiny negative from cancellation
    std = jnp.sqrt(var)

    # Per-row reciprocal on the (tr, 1) column instead of a per-element divide
    # over the whole (tr, feat) tile.
    inv = pl.reciprocal(std + jnp.float32(eps), approx=False)

    a = a_ref[...].astype(jnp.float32)
    b = b_ref[...].astype(jnp.float32)
    o_ref[...] = ((x - mean) * inv * a + b).astype(o_ref.dtype)


def _pick_tile_rows(rows, feat, itemsize, working_budget_bytes):
    """Largest row tile whose double-buffered in/out tiles + f32 working set
    fit the budget, rounded to a sublane multiple, capped so the grid keeps
    at least 2 steps when there is enough work (v7x has 2 TensorCores)."""
    # 2x input buf + 2x output buf (x dtype) + ~3 f32 working copies per tile.
    per_row_bytes = feat * (4 * itemsize + 3 * 4)
    tr = working_budget_bytes // max(per_row_bytes, 1)
    tr = min(tr, 2048, max(rows, 8))
    tr = max(8, (tr // 8) * 8)              # sublane-aligned
    if rows > 8:
        half = ((rows + 1) // 2 + 7) // 8 * 8
        tr = min(tr, half)                  # keep grid >= 2 steps
    return tr


def layer_norm(x, a_2, b_2, eps=1e-6):
    """x: (..., F); a_2, b_2: (F,). Returns same shape/dtype as x."""
    orig_shape = x.shape
    feat = orig_shape[-1]
    rows = 1
    for s in orig_shape[:-1]:
        rows *= s

    x2 = x.reshape(rows, feat)
    a2 = a_2.reshape(1, feat)
    b2 = b_2.reshape(1, feat)

    # Tile sizing: ~24 MiB working budget is safe on v7x (64 MiB physical VMEM)
    # and leaves headroom on v5e/v6e; scoped limit raised explicitly below.
    itemsize = jnp.dtype(x.dtype).itemsize
    tr = _pick_tile_rows(rows, feat, itemsize, working_budget_bytes=24 << 20)

    # Pad rows to a tile multiple (padded rows are sliced off afterwards)
    # instead of falling back to one giant un-pipelined block.
    n_tiles = pl.cdiv(rows, tr)
    rows_padded = n_tiles * tr
    if rows_padded != rows:
        x2 = jnp.pad(x2, ((0, rows_padded - rows), (0, 0)))

    # TODO(synk): for feat < 128 the stores are lane-masked (only `feat` of 128
    # lanes used); a lane-dense repack (fold rows into lanes + segmented
    # reductions) would further help store bandwidth, mainly on v5e.

    kernel = functools.partial(_layernorm_kernel, eps=eps, feat=feat)

    cost = pl.CostEstimate(
        flops=8 * rows_padded * feat,
        transcendentals=2 * rows_padded,                 # sqrt + reciprocal per row
        bytes_accessed=2 * rows_padded * feat * itemsize + 2 * feat * 4,
    )

    out = pl.pallas_call(
        kernel,
        out_shape=jax.ShapeDtypeStruct((rows_padded, feat), x.dtype),
        grid_spec=pltpu.PrefetchScalarGridSpec(
            num_scalar_prefetch=0,
            grid=(n_tiles,),
            in_specs=[
                pl.BlockSpec((tr, feat), lambda i: (i, 0)),
                pl.BlockSpec((1, feat), lambda i: (0, 0)),
                pl.BlockSpec((1, feat), lambda i: (0, 0)),
            ],
            out_specs=pl.BlockSpec((tr, feat), lambda i: (i, 0)),
        ),
        compiler_params=pltpu.CompilerParams(
            dimension_semantics=("parallel",),
            vmem_limit_bytes=48 << 20,      # raise v5e/v6e default, < v7x 64 MiB
        ),
        cost_estimate=cost,
    )(x2, a2, b2)

    if rows_padded != rows:
        out = out[:rows]
    return out.reshape(orig_shape)


if __name__ == "__main__":
    # Deterministic parameters (as in __init__: ones / zeros) and inputs.
    batch, seq, hidden = 2, 8, 32
    key = jax.random.PRNGKey(0)
    x = jax.random.normal(key, (batch, seq, hidden), dtype=jnp.float32)

    a_2 = jnp.ones((hidden,), dtype=jnp.float32)   # scale
    b_2 = jnp.zeros((hidden,), dtype=jnp.float32)  # shift
    eps = 1e-6

    out = layer_norm(x, a_2, b_2, eps=eps)
    out = jax.block_until_ready(out)

    # Reference check in plain JAX (unbiased std, matching torch.std).
    mean = jnp.mean(x, axis=-1, keepdims=True)
    std = jnp.sqrt(jnp.sum((x - mean) ** 2, axis=-1, keepdims=True) / (hidden - 1))
    ref = a_2 * (x - mean) / (std + eps) + b_2
    assert jnp.allclose(out, ref, atol=1e-5, rtol=1e-5), "mismatch vs reference"

    print("KERNEL_OK")
</pallas_src>

<mosaic_0001>
module attributes {stable_mosaic.version = 11 : i64} {
  func.func @_layernorm_kernel(%arg0: i32, %arg1: memref<8x32xf32, #tpu.memory_space<vmem>>, %arg2: memref<1x32xf32, #tpu.memory_space<vmem>>, %arg3: memref<1x32xf32, #tpu.memory_space<vmem>>, %arg4: memref<8x32xf32, #tpu.memory_space<vmem>>) attributes {dimension_semantics = [#tpu.dimension_semantics<parallel>], iteration_bounds = array<i64: 2>, scalar_prefetch = 0 : i64, scratch_operands = 0 : i64, tpu.core_type = #tpu.core_type<tc>, window_params = [{transform_indices = @transform_0, window_bounds = array<i64: 8, 32>}, {pipeline_mode = #tpu.pipeline_mode<synchronous>, transform_indices = @transform_1, window_bounds = array<i64: 1, 32>}, {pipeline_mode = #tpu.pipeline_mode<synchronous>, transform_indices = @transform_2, window_bounds = array<i64: 1, 32>}, {transform_indices = @transform_3, window_bounds = array<i64: 8, 32>}]} {
    %c0 = arith.constant 0 : index
    %c0_0 = arith.constant 0 : index
    %0 = vector.load %arg1[%c0, %c0_0] : memref<8x32xf32, #tpu.memory_space<vmem>>, vector<8x32xf32>
    %cst = arith.constant dense<0.000000e+00> : vector<8xf32>
    %1 = vector.multi_reduction <add>, %0, %cst [1] : vector<8x32xf32> to vector<8xf32>
    %2 = vector.shape_cast %1 : vector<8xf32> to vector<8x1xf32>
    %3 = arith.mulf %0, %0 : vector<8x32xf32>
    %cst_1 = arith.constant dense<0.000000e+00> : vector<8xf32>
    %4 = vector.multi_reduction <add>, %3, %cst_1 [1] : vector<8x32xf32> to vector<8xf32>
    %5 = vector.shape_cast %4 : vector<8xf32> to vector<8x1xf32>
    %cst_2 = arith.constant 3.125000e-02 : f32
    %6 = vector.broadcast %cst_2 : f32 to vector<8x1xf32>
    %7 = arith.mulf %2, %6 : vector<8x1xf32>
    %8 = arith.mulf %7, %2 : vector<8x1xf32>
    %9 = arith.subf %5, %8 : vector<8x1xf32>
    %cst_3 = arith.constant 0.0322580636 : f32
    %10 = vector.broadcast %cst_3 : f32 to vector<8x1xf32>
    %11 = arith.mulf %9, %10 : vector<8x1xf32>
    %cst_4 = arith.constant 0.000000e+00 : f32
    %12 = vector.broadcast %cst_4 : f32 to vector<8x1xf32>
    %13 = arith.maximumf %11, %12 : vector<8x1xf32>
    %14 = math.sqrt %13 : vector<8x1xf32>
    %cst_5 = arith.constant 9.99999997E-7 : f32
    %15 = vector.broadcast %cst_5 : f32 to vector<8x1xf32>
    %16 = arith.addf %14, %15 : vector<8x1xf32>
    %17 = tpu.reciprocal %16 : vector<8x1xf32> -> vector<8x1xf32>
    %c0_6 = arith.constant 0 : index
    %c0_7 = arith.constant 0 : index
    %18 = vector.load %arg2[%c0_6, %c0_7] : memref<1x32xf32, #tpu.memory_space<vmem>>, vector<1x32xf32>
    %c0_8 = arith.constant 0 : index
    %c0_9 = arith.constant 0 : index
    %19 = vector.load %arg3[%c0_8, %c0_9] : memref<1x32xf32, #tpu.memory_space<vmem>>, vector<1x32xf32>
    %20 = vector.broadcast %7 : vector<8x1xf32> to vector<8x32xf32>
    %21 = arith.subf %0, %20 : vector<8x32xf32>
    %22 = vector.broadcast %17 : vector<8x1xf32> to vector<8x32xf32>
    %23 = arith.mulf %21, %22 : vector<8x32xf32>
    %24 = vector.broadcast %18 : vector<1x32xf32> to vector<8x32xf32>
    %25 = arith.mulf %23, %24 : vector<8x32xf32>
    %26 = vector.broadcast %19 : vector<1x32xf32> to vector<8x32xf32>
    %27 = arith.addf %25, %26 : vector<8x32xf32>
    %c0_10 = arith.constant 0 : index
    %c0_11 = arith.constant 0 : index
    %28 = vector.load %arg4[%c0_10, %c0_11] : memref<8x32xf32, #tpu.memory_space<vmem>>, vector<8x32xf32>
    tpu.vector_store %arg4[%c0_10, %c0_11], %27 {strides = array<i32>} : memref<8x32xf32, #tpu.memory_space<vmem>>, vector<8x32xf32>,
    return
  }
  func.func @transform_0(%arg0: i32) -> (i32, i32) {
    %c0_i32 = arith.constant 0 : i32
    %c0_i32_0 = arith.constant 0 : i32
    return %arg0, %c0_i32 : i32, i32
  }
  func.func @transform_1(%arg0: i32) -> (i32, i32) {
    %c0_i32 = arith.constant 0 : i32
    %c0_i32_0 = arith.constant 0 : i32
    %c0_i32_1 = arith.constant 0 : i32
    return %c0_i32, %c0_i32_0 : i32, i32
  }
  func.func @transform_2(%arg0: i32) -> (i32, i32) {
    %c0_i32 = arith.constant 0 : i32
    %c0_i32_0 = arith.constant 0 : i32
    %c0_i32_1 = arith.constant 0 : i32
    return %c0_i32, %c0_i32_0 : i32, i32
  }
  func.func @transform_3(%arg0: i32) -> (i32, i32) {
    %c0_i32 = arith.constant 0 : i32
    %c0_i32_0 = arith.constant 0 : i32
    return %arg0, %c0_i32 : i32, i32
  }
}

</mosaic_0001>

<bundles_post_ra>
// kernel: tpu_custom_call.1
= control target key start
LH: loop header
LB: loop body
LE: loop exit
PB: predicated region body
PF: predicated region fallthrough
CT: control target
= control target key end

     0   :  { %8 = vsyncpa [#allocation3], 0  ;;  %s731_s0 = inlined_call_operand.hbm [shape: f32[16,32], index: 0, kind: input, shape index: {}]   ;;  %s732_s1 = inlined_call_operand.hbm [shape: f32[1,32], index: 1, kind: input, shape index: {}]   ;;  %s733_s2 = inlined_call_operand.vmem [shape: f32[1,32], index: 2, kind: input, shape index: {}]   ;;  %s734_s3 = inlined_call_operand.hbm [shape: f32[16,32], index: 3, kind: output, shape index: {}]  }
   0x1   :  { %10 = vsyncpa [#allocation3 + $0x1], 0 }
   0x2   :  { %11 = vsyncpa [#allocation6], 0 }
   0x3   :  { %12 = vsyncpa [#allocation4], 0 }
   0x4   :  { %14 = vsyncpa [#allocation4 + $0x1], 0  ;;  %s583_s12 = smov 0   ;;  %s585_s13 = smov 0  }
   0x5   :  { %s587_s14 = smov 0   ;;  %s589_s15 = smov 0  }
   0x6 LB: > { %s604_s16 = sadd.s32 4294967295, %s560_s15   ;;  %s353_s17 = sadd.s32 4294967294, %s560_s15   ;;  %s560_s15 = sphi %s589_s15, %s744_s15   ;;  %s556_s14 = sphi %s587_s14, %s743_s14   ;;  %s552_s13 = sphi %s585_s13, %s742_s13   ;;  %s548_s12 = sphi %s583_s12, %s741_s12  }
   0x7   : > { %p40_p0 = scmp.ne.s32.totalorder %s552_s13, %s548_s12  ;;  %p41_p1 = scmp.eq.s32.totalorder %s604_s16, 0 }
   0x8   : > { %p106_p2 = scmp.eq.s32.totalorder %s604_s16, 1  ;;  %p112_p3 = scmp.eq.s32.totalorder %s353_s17, 1 }
   0x9   : > { %p613_p4 = por %p41_p1, %p40_p0  ;;  %p354_p5 = scmp.ge.s32.totalorder %s560_s15, 1 }
   0xa   : > { %p618_p6 = por %p112_p3, %p40_p0  ;;  %p119_p7 = scmp.lt.s32.totalorder %s560_s15, 3 }
   0xb   : > { %s131_s22 = sshll.u32 %s732_s1, 4  ;;  %s562_s24 = smov [#allocation5]   ;;  %s132_s22 = int_to_ptr.hbm [resolvable:$true] %s131_s22 }
   0xc   : > { %p626_p8 = pnand %p354_p5, %p119_p7  ;;  %s133_s25 = sshll.u32 %s562_s24, 4  ;;  %s134_s25 = int_to_ptr.vmem [resolvable:$true] %s133_s25 }
   0xd   : > { %s636_s26 = sadd.s32 1, %s560_s15   ;;  %s27_s27 = sadd.s32 1, %s556_s14 }
   0xe   : > { %p375_p10 = pneg %p626_p8  ;;  %s24_s28 = ssub.s32 %s560_s15, %s636_s26 }
   0xf   : > { %p25_p12 = scmp.eq.s32.totalorder %s24_s28, 0  ;;  %p34_p13 = scmp.ne.s32.totalorder %s556_s14, %s552_s13 }
  0x10   : > { %p376_p11 = pnand %p375_p10, %p41_p1  ;;  %p35_p0 = scmp.eq.s32.totalorder %s560_s15, 0 }
  0x11   : > { %s645_s29 = scalar_select %p25_p12, %s556_s14, %s27_s27  }
  0x12   : > { %378 = dma.hbm_to_vmem [thread:$0]  (!%p376_p11), %s132_s22, 16, %s134_s25, [#allocation6]  }
  0x13   : > { %p649_p3 = por %p106_p2, %p34_p13  ;;  %p388_p5 = scmp.lt.s32.totalorder %s560_s15, 2 }
  0x14   : > { %s147_s4 = sand.u32 1, %s556_s14   ;;  %s358_s5 = sshll.u32 %s560_s15, 3 }
  0x15   : > { %p36_p7 = por %p35_p0, %p34_p13  ;;  %s357_s6 = sshll.u32 %s147_s4, 3 }
  0x16   : > { %s155_s9 = scalar_lea.hbm %s731_s0, %s358_s5  ;;  %s151_s11 = scalar_lea.vmem [#allocation2], %s357_s6 }
  0x17   : > { %s157_s10 = sshll.u32 %s155_s9, 4  ;;  %s159_s17 = sshll.u32 %s151_s11, 4  ;;  %s158_s10 = int_to_ptr.hbm [resolvable:$true] %s157_s10  ;;  %s160_s17 = int_to_ptr.vmem [resolvable:$true] %s159_s17 }
  0x18   : > { %p659_p10 = pnand %p388_p5, %p36_p7  ;;  %s148_s21 = scalar_lea.sflag [#allocation3], %s147_s4 }
  0x19   : > { %s460_s22 = sshra.s32 %s158_s10, 4  ;;  %s467_s28 = scalar_lea.hbm %s731_s0, 16  ;;  %s461_s22 = int_to_ptr.hbm [resolvable:$true] %s460_s22 }
  0x1a   : > { %s462_s24 = scalar_lea.hbm %s461_s22, 8  ;;  %p464_p11 = pneg %p659_p10 }
  0x1b   : > { %p463_p2 = scmp.ne.s32.totalorder %s461_s22, %s462_s24  ;;  %p468_p0 = scmp.lt.s32.totalorder %s461_s22, %s731_s0 }
  0x1c   : > { %p469_p5 = scmp.lt.s32.totalorder %s467_s28, %s462_s24 }
  0x1d   : > { %p465_p12 = pnand %p464_p11, %p463_p2 }
  0x1e   : > { %p470_p7 = por %p469_p5, %p468_p0 }
  0x1f   : > { %p466_p13 = pneg %p465_p12 }
  0x21   : > { %p471_p9 = pnand %p470_p7, %p466_p13 }
  0x23   : > { %474 = shalt.err (!%p471_p9)
}
  0x24   : > { %382 = dma.hbm_to_vmem [thread:$0]  (!%p659_p10), %s158_s10, 128, %s160_s17, %s148_s21  }
  0x25   : > { %168 = sbr.rel (%p626_p8) target bundleno = 226 (0xe2), region = 32  ;;  %s676_s4 = sand.u32 (!%p626_p8), 1, %s552_s13  }
  0x26   : > { %s360_s7 = sshll.u32 (!%p626_p8), %s676_s4, 3  ;;  %s171_s8 = scalar_lea.sflag (!%p626_p8), [#allocation3], %s676_s4 }
  0x27   : > { %s174_s9 = scalar_lea.vmem (!%p626_p8), [#allocation2], %s360_s7 }
  0x2a   : > { %535 = dma.done.wait (%p613_p4), %s171_s8, 128  }
  0x2b   : > { %537 = vsyncadd (%p613_p4), %s171_s8, 4294967168 }
  0x2c   : > { %539 = dma.done.wait (%p41_p1), [#allocation6], 16  }
  0x2d   : > { %541 = vsyncadd (%p41_p1), [#allocation6], 4294967280  ;;  %vm204_vm0 = vcmask 261120   ;;  %v203_v0 = vld [vmem:[%s174_s9] sm:$0xff]  ;;  %s364_s18 = sshll.u32 %s604_s16, 3  ;;  %s202_s16 = scalar_lea.vmem [#allocation7], %s360_s7 }
  0x2e   : > { %v205_v1 = vsel %vm204_vm0, %v203_v0, 0.0  ;;  %v208_v2 = vmul.f32 %v203_v0, %v203_v0  ;;  %v424_v32 = vld [vmem:[#allocation5] ss:$0 sm:$0xff]  ;;  %s268_s11 = scalar_lea.hbm %s734_s3, %s364_s18  ;;  %v425_v35 = vld [vmem:[%s733_s2] ss:$0 sm:$0xff]  ;;  %s270_s21 = sshll.u32 %s202_s16, 4  ;;  %s271_s21 = int_to_ptr.vmem [resolvable:$true] %s270_s21 }
  0x2f   : > { %206 = vadd.xlane.f32.xlu0 %v205_v1  ;;  %s272_s22 = sshll.u32 %s268_s11, 4  ;;  %s258_s24 = scalar_lea.sflag [#allocation4], %s676_s4  ;;  %s273_s22 = int_to_ptr.hbm [resolvable:$true] %s272_s22 }
  0x30   : > { %v209_v3 = vsel %vm204_vm0, %v208_v2, 0.0  ;;  %s504_s25 = sshra.s32 %s273_s22, 4  ;;  %s510_s6 = scalar_lea.hbm %s734_s3, 16  ;;  %s505_s25 = int_to_ptr.hbm [resolvable:$true] %s504_s25 }
  0x31   : > { %s506_s27 = scalar_lea.hbm %s505_s25, 8  ;;  %p511_p9 = scmp.lt.s32.totalorder %s505_s25, %s734_s3 }
  0x32   : > { %p507_p1 = scmp.ne.s32.totalorder %s505_s25, %s506_s27  ;;  %p512_p10 = scmp.lt.s32.totalorder %s510_s6, %s506_s27 }
  0x34   : > { %p508_p4 = pnand %p507_p1, %p649_p3  ;;  %p513_p2 = por %p512_p10, %p511_p9 }
  0x36   : > { %p509_p8 = pneg %p508_p4 }
  0x37   : > { %210 = vadd.xlane.f32.xlu0 %v209_v3 }
  0x38   : > { %p514_p11 = pnand %p513_p2, %p509_p8 }
  0xa2   : > { %v207_v4 = vpop.xlane.xlu0 %206 }
  0xa3   : > { %v212_v5 = vmul.f32 0.03125, %v207_v4 }
  0xa5   : > { %v213_v6 = vmul.f32 %v212_v5, %v207_v4  ;;  %v246_v30 = vsub.f32 %v203_v0, %v212_v5 }
  0xaa   : > { %v211_v7 = vpop.xlane.xlu0 %210 }
  0xab   : > { %v214_v8 = vsub.f32 %v211_v7, %v213_v6 }
  0xad   : > { %v215_v9 = vmul.f32 0.032258064, %v214_v8 }
  0xaf   : > { %v216_v10 = vmax.f32 %v215_v9, 0.0 }
  0xb1   : > { %426 = vrsqrt.f32 %v216_v10  ;;  %vm224_vm1 = vcmp.eq.f32.partialorder %v216_v10, inf  ;;  %v227_v18 = vand.u32 2147483648, %v216_v10  ;;  %vm226_vm2 = vcmp.eq.f32.partialorder %v216_v10, 0.0 }
  0xb7   : > { %v427_v11 = vpop.eup %426 }
  0xb8   : > { %v218_v12 = vmul.f32 %v427_v11, %v216_v10 }
  0xba   : > { %v219_v13 = vmul.f32 %v427_v11, %v218_v12 }
  0xbc   : > { %v220_v14 = vmul.f32 0.5, %v219_v13 }
  0xbe   : > { %v221_v15 = vsub.f32 1.5, %v220_v14 }
  0xc0   : > { %v222_v16 = vmul.f32 %v427_v11, %v221_v15 }
  0xc2   : > { %v223_v17 = vmul.f32 %v222_v16, %v216_v10 }
  0xc4   : > { %v225_v19 = vsel %vm224_vm1, %v216_v10, %v223_v17 }
  0xc5   : > { %v228_v20 = vsel %vm226_vm2, %v227_v18, %v225_v19 }
  0xc6   : > { %v229_v21 = vadd.f32 1e-06, %v228_v20 }
  0xc8   : > { %428 = vrcp.f32 %v229_v21  ;;  %v241_v25 = vand.u32 2147483648, %v229_v21  ;;  %v239_v27 = vand.u32 2147483647, %v229_v21  ;;  %vm235_vm4 = vweird.f32 %v229_v21 }
  0xca   : > { %v242_v29 = vor.u32 1.1754944e-38, %v241_v25  ;;  %vm240_vm6 = vcmp.eq.f32.partialorder %v239_v27, 8.507059e+37 }
  0xce   : > { %v429_v22 = vpop.eup %428 }
  0xcf   : > { %v231_v23 = vmul.f32 %v429_v22, %v229_v21  ;;  %vm236_vm3 = vweird.f32 %v429_v22 }
  0xd0   : > { %vm237_vm5 = vmor %vm235_vm4, %vm236_vm3 }
  0xd1   : > { %v232_v24 = vsub.f32 1.0, %v231_v23 }
  0xd3   : > { %v233_v26 = vmul.f32 %v429_v22, %v232_v24 }
  0xd5   : > { %v234_v28 = vadd.f32 %v429_v22, %v233_v26 }
  0xd7   : > { %v238_v31 = vsel %vm237_vm5, %v429_v22, %v234_v28 }
  0xd8   : > { %v243_v33 = vsel %vm240_vm6, %v242_v29, %v238_v31 }
  0xd9   : > { %v247_v34 = vmul.f32 %v246_v30, %v243_v33 }
  0xdb   : > { %v251_v36 = vmul.f32 %v424_v32, %v247_v34 }
  0xdd   : > { %v255_v37 = vadd.f32 %v425_v35, %v251_v36 }
  0xdf   : > { %256 = vst.msk [vmem:[%s202_s16] sm:$0xff] %vm204_vm0, %v255_v37 }
  0xe0   : > { %517 = shalt.err (!%p514_p11)
}
  0xe1   : > { %373 = dma.vmem_to_hbm [thread:$0]  (%p649_p3), %s271_s21, 128, %s273_s22, %s258_s24  }
  0xe2 PF: > { %s284_s4 = sand.u32 1, %s548_s12   ;;  %p740_p12 = scmp.ge.s32.totalorder %s560_s15, 2 }
  0xe3   : > { %s285_s9 = scalar_lea.sflag [#allocation4], %s284_s4 }
  0xe4   : > { %p384_p13 = pnand %p740_p12, %p618_p6 }
  0xe6   : > { %p385_p0 = pneg %p384_p13 }
  0xe8   : > { %543 = dma.done.wait (%p385_p0), %s285_s9, 128  }
  0xe9   : > { %545 = vsyncadd (%p385_p0), %s285_s9, 4294967168  ;;  %p17_p5 = scmp.ge.s32.totalorder %s636_s26, 4   ;;  %s741_s12 = smov %s552_s13 }
  0xea   : > { %s742_s13 = smov %s556_s14  ;;  %s743_s14 = smov %s645_s29 }
  0xeb   : > { %s744_s15 = smov %s636_s26  ;;  %19 = sbr.rel (!%p17_p5) target bundleno = 6 (0x6), region = 81 }
  0xf0   :  { %291 = vsyncpa [#allocation3], 1 }
  0xf1   :  { %293 = vsyncpa [#allocation3 + $0x1], 1 }
  0xf2   :  { %294 = vsyncpa [#allocation6], 1 }
  0xf3   :  { %295 = vsyncpa [#allocation4], 1 }
  0xf4   :  { %297 = vsyncpa [#allocation4 + $0x1], 1 }

</bundles_post_ra>
